<compile_context>
chip_gen: v7x
topology: tpu7x:2x2x1
jax: 0.10.0
libtpu: 0.0.40
codegen_flags: <defaults>
</compile_context>

<pallas_src>
import jax
import jax.numpy as jnp
from jax.experimental import pallas as pl
from jax.experimental.pallas import tpu as pltpu


def _arima_fir_kernel(params_ref, x_ref, out_ref):
    # params_ref: SMEM f32[4] = [phi1, phi2, theta1, c]
    # x_ref/out_ref: VMEM [TB, Sp]
    x = x_ref[...].astype(jnp.float32)
    Sp = x.shape[-1]

    phi1 = params_ref[0]
    phi2 = params_ref[1]
    th1 = params_ref[2]
    c = params_ref[3]

    # FIR coefficients (scalar unit, essentially free).
    a1 = 1.0 + phi1 + th1
    a2 = (phi2 - phi1) - th1 * (1.0 + phi1)
    a3 = -phi2 - th1 * (phi2 - phi1)
    a4 = th1 * phi2

    # Per-lane coefficient rows ((1, Sp), broadcast over sublanes).  Lanes where
    # a lag would reach before t=0 get a zero coefficient, which also
    # neutralizes the circular wrap of pltpu.roll and any tail padding.
    lane = jax.lax.broadcasted_iota(jnp.int32, (1, Sp), 1)
    zero = jnp.float32(0.0)
    c1 = jnp.where(lane >= 1, a1, zero)
    c2 = jnp.where(lane >= 2, a2, zero)
    c3 = jnp.where(lane >= 3, a3, zero)
    c4 = jnp.where(lane >= 4, a4, zero)
    # Constant term: c at t=0, c*(1-theta1) for t>=1 (lag1(e) drops -c at t=0).
    c0 = jnp.where(lane >= 1, c * (1.0 - th1), c)

    # All four lags are rolls of the raw input -> independent, issue up front
    # on the XLU slot.
    r1 = pltpu.roll(x, shift=1, axis=1)
    r2 = pltpu.roll(x, shift=2, axis=1)
    r3 = pltpu.roll(x, shift=3, axis=1)
    r4 = pltpu.roll(x, shift=4, axis=1)

    xp = c0 + c1 * r1 + c2 * r2 + c3 * r3 + c4 * r4
    out_ref[...] = xp.astype(out_ref.dtype)


def _round_up(v, m):
    return ((v + m - 1) // m) * m


def _pick_batch_tile(B, row_bytes, target_block_bytes):
    """Batch-tile rows (multiple of 8) targeting ~target_block_bytes blocks and
    an even grid-step count >= 4 (v7x dual-TC balance), never collapsing to
    sub-512KiB blocks just to hit the step-count heuristic."""
    # Enough steps to hit the target block size, at least 4 and even.
    n_steps = max(4, pl.cdiv(B * row_bytes, target_block_bytes))
    n_steps += n_steps % 2
    tb = max(8, _round_up(pl.cdiv(B, n_steps), 8))
    tb = min(tb, _round_up(B, 8))

    # Refinement: keep halving while steps are odd or < 4, with a block-size floor.
    min_block_bytes = 512 << 10
    steps = pl.cdiv(B, tb)
    while tb > 8 and (steps < 4 or steps % 2) and (tb // 2) * row_bytes >= min_block_bytes:
        new_tb = max(8, ((tb // 2) // 8) * 8)
        if new_tb == tb:
            break
        tb = new_tb
        steps = pl.cdiv(B, tb)
    return tb


def deep_nn_arima_forward(x, params, *, target_block_bytes=4 << 20):
    """x: f32[B, S]  params: f32[4] = [phi1, phi2, theta1, c]  ->  f32[B, S]"""
    B, S = x.shape
    out_dtype = x.dtype
    elt = jnp.dtype(x.dtype).itemsize

    # Lane-dense stores: pad S to a multiple of 128 (tail pad only; padded lanes
    # are sliced off, and masked FIR coefficients ignore the roll wrap).
    Sp = _round_up(S, 128)
    if Sp != S:
        x = jnp.pad(x, ((0, 0), (0, Sp - S)))

    row_bytes = Sp * elt
    tb = _pick_batch_tile(B, row_bytes, target_block_bytes)
    grid = (pl.cdiv(B, tb),)  # ragged last block handled by Pallas OOB masking

    block_bytes = tb * row_bytes
    # (in + out) x double-buffering + slack, capped so it is safe on v7x's
    # 64 MiB physical VMEM as well as v5e/v6e.
    vmem_limit = int(min(48 << 20, max(32 << 20, 4 * block_bytes + (4 << 20))))

    # Purely memory-bound: ~9 VPU ops/element, 2 full HBM streams.
    cost = pl.CostEstimate(
        flops=9 * B * Sp, transcendentals=0, bytes_accessed=2 * B * Sp * elt)

    out = pl.pallas_call(
        _arima_fir_kernel,
        out_shape=jax.ShapeDtypeStruct((B, Sp), out_dtype),
        grid_spec=pltpu.PrefetchScalarGridSpec(
            num_scalar_prefetch=0,
            grid=grid,
            in_specs=[
                pl.BlockSpec(memory_space=pltpu.MemorySpace.SMEM),  # params
                pl.BlockSpec((tb, Sp), lambda i: (i, 0)),           # x tile
            ],
            out_specs=pl.BlockSpec((tb, Sp), lambda i: (i, 0)),
        ),
        compiler_params=pltpu.CompilerParams(
            dimension_semantics=("parallel",),
            vmem_limit_bytes=vmem_limit,
        ),
        cost_estimate=cost,
    )(params, x)

    if Sp != S:
        out = out[:, :S]
    return out


def _reference(x, params):
    """Chained ARIMA(2,1,1) analyze pass (independent formulation of the FIR)."""
    phi1, phi2, th1, c = [jnp.float32(p) for p in params]

    def lag(v, k):
        return jnp.concatenate(
            [jnp.zeros(v.shape[:-1] + (k,), v.dtype), v[..., :-k]], axis=-1)

    x_lag1 = lag(x, 1)
    dx = x - x_lag1
    ar = c + phi1 * lag(dx, 1) + phi2 * lag(dx, 2)
    e = dx - ar
    y = ar + th1 * lag(e, 1)
    return x_lag1 + y


if __name__ == "__main__":
    key = jax.random.PRNGKey(0)
    B, S = 16, 256                      # small time-series batch
    x = jax.random.normal(key, (B, S), dtype=jnp.float32)

    # deterministic ARIMA parameters: [phi1, phi2, theta1, c]
    params = jnp.array([0.5, -0.25, 0.3, 0.01], dtype=jnp.float32)

    out = deep_nn_arima_forward(x, params)
    out = jax.block_until_ready(out)

    ref = _reference(x, params)
    assert out.shape == x.shape and out.dtype == x.dtype
    assert jnp.allclose(out, ref, atol=1e-5, rtol=1e-5)

    print("KERNEL_OK")
</pallas_src>

<mosaic_0001>
module attributes {stable_mosaic.version = 11 : i64} {
  func.func @_arima_fir_kernel(%arg0: i32, %arg1: memref<4xf32, #tpu.memory_space<smem>>, %arg2: memref<8x256xf32, #tpu.memory_space<vmem>>, %arg3: memref<8x256xf32, #tpu.memory_space<vmem>>) attributes {dimension_semantics = [#tpu.dimension_semantics<parallel>], iteration_bounds = array<i64: 2>, scalar_prefetch = 0 : i64, scratch_operands = 0 : i64, tpu.core_type = #tpu.core_type<tc>, window_params = [{transform_indices = @transform_0, window_bounds = array<i64: 4>}, {transform_indices = @transform_1, window_bounds = array<i64: 8, 256>}, {transform_indices = @transform_2, window_bounds = array<i64: 8, 256>}]} {
    %c0 = arith.constant 0 : index
    %c0_0 = arith.constant 0 : index
    %0 = vector.load %arg2[%c0, %c0_0] : memref<8x256xf32, #tpu.memory_space<vmem>>, vector<8x256xf32>
    %c0_1 = arith.constant 0 : index
    %1 = memref.load %arg1[%c0_1] : memref<4xf32, #tpu.memory_space<smem>>
    %c1 = arith.constant 1 : index
    %2 = memref.load %arg1[%c1] : memref<4xf32, #tpu.memory_space<smem>>
    %c2 = arith.constant 2 : index
    %3 = memref.load %arg1[%c2] : memref<4xf32, #tpu.memory_space<smem>>
    %c3 = arith.constant 3 : index
    %4 = memref.load %arg1[%c3] : memref<4xf32, #tpu.memory_space<smem>>
    %cst = arith.constant 1.000000e+00 : f32
    %5 = arith.addf %cst, %1 : f32
    %6 = arith.addf %5, %3 : f32
    %7 = arith.subf %2, %1 : f32
    %cst_2 = arith.constant 1.000000e+00 : f32
    %8 = arith.addf %cst_2, %1 : f32
    %9 = arith.mulf %3, %8 : f32
    %10 = arith.subf %7, %9 : f32
    %cst_3 = arith.constant 0.000000e+00 : f32
    %11 = arith.subf %cst_3, %2 : f32
    %12 = arith.subf %2, %1 : f32
    %13 = arith.mulf %3, %12 : f32
    %14 = arith.subf %11, %13 : f32
    %15 = arith.mulf %3, %2 : f32
    %16 = tpu.iota {dimensions = array<i32: 1>} : vector<1x256xi32>
    %c1_i32 = arith.constant 1 : i32
    %17 = vector.broadcast %c1_i32 : i32 to vector<1x256xi32>
    %18 = arith.cmpi sge, %16, %17 : vector<1x256xi32>
    %cst_4 = arith.constant 0.000000e+00 : f32
    %19 = vector.broadcast %6 : f32 to vector<1x256xf32>
    %20 = vector.broadcast %cst_4 : f32 to vector<1x256xf32>
    %21 = arith.select %18, %19, %20 : vector<1x256xi1>, vector<1x256xf32>
    %c2_i32 = arith.constant 2 : i32
    %22 = vector.broadcast %c2_i32 : i32 to vector<1x256xi32>
    %23 = arith.cmpi sge, %16, %22 : vector<1x256xi32>
    %cst_5 = arith.constant 0.000000e+00 : f32
    %24 = vector.broadcast %10 : f32 to vector<1x256xf32>
    %25 = vector.broadcast %cst_5 : f32 to vector<1x256xf32>
    %26 = arith.select %23, %24, %25 : vector<1x256xi1>, vector<1x256xf32>
    %c3_i32 = arith.constant 3 : i32
    %27 = vector.broadcast %c3_i32 : i32 to vector<1x256xi32>
    %28 = arith.cmpi sge, %16, %27 : vector<1x256xi32>
    %cst_6 = arith.constant 0.000000e+00 : f32
    %29 = vector.broadcast %14 : f32 to vector<1x256xf32>
    %30 = vector.broadcast %cst_6 : f32 to vector<1x256xf32>
    %31 = arith.select %28, %29, %30 : vector<1x256xi1>, vector<1x256xf32>
    %c4_i32 = arith.constant 4 : i32
    %32 = vector.broadcast %c4_i32 : i32 to vector<1x256xi32>
    %33 = arith.cmpi sge, %16, %32 : vector<1x256xi32>
    %cst_7 = arith.constant 0.000000e+00 : f32
    %34 = vector.broadcast %15 : f32 to vector<1x256xf32>
    %35 = vector.broadcast %cst_7 : f32 to vector<1x256xf32>
    %36 = arith.select %33, %34, %35 : vector<1x256xi1>, vector<1x256xf32>
    %c1_i32_8 = arith.constant 1 : i32
    %37 = vector.broadcast %c1_i32_8 : i32 to vector<1x256xi32>
    %38 = arith.cmpi sge, %16, %37 : vector<1x256xi32>
    %cst_9 = arith.constant 1.000000e+00 : f32
    %39 = arith.subf %cst_9, %3 : f32
    %40 = arith.mulf %4, %39 : f32
    %41 = vector.broadcast %40 : f32 to vector<1x256xf32>
    %42 = vector.broadcast %4 : f32 to vector<1x256xf32>
    %43 = arith.select %38, %41, %42 : vector<1x256xi1>, vector<1x256xf32>
    %c1_i32_10 = arith.constant 1 : i32
    %44 = tpu.dynamic_rotate %0 by %c1_i32_10 dim 1 : vector<8x256xf32>, i32 -> vector<8x256xf32>
    %c2_i32_11 = arith.constant 2 : i32
    %45 = tpu.dynamic_rotate %0 by %c2_i32_11 dim 1 : vector<8x256xf32>, i32 -> vector<8x256xf32>
    %c3_i32_12 = arith.constant 3 : i32
    %46 = tpu.dynamic_rotate %0 by %c3_i32_12 dim 1 : vector<8x256xf32>, i32 -> vector<8x256xf32>
    %c4_i32_13 = arith.constant 4 : i32
    %47 = tpu.dynamic_rotate %0 by %c4_i32_13 dim 1 : vector<8x256xf32>, i32 -> vector<8x256xf32>
    %48 = vector.broadcast %21 : vector<1x256xf32> to vector<8x256xf32>
    %49 = arith.mulf %48, %44 : vector<8x256xf32>
    %50 = vector.broadcast %43 : vector<1x256xf32> to vector<8x256xf32>
    %51 = arith.addf %50, %49 : vector<8x256xf32>
    %52 = vector.broadcast %26 : vector<1x256xf32> to vector<8x256xf32>
    %53 = arith.mulf %52, %45 : vector<8x256xf32>
    %54 = arith.addf %51, %53 : vector<8x256xf32>
    %55 = vector.broadcast %31 : vector<1x256xf32> to vector<8x256xf32>
    %56 = arith.mulf %55, %46 : vector<8x256xf32>
    %57 = arith.addf %54, %56 : vector<8x256xf32>
    %58 = vector.broadcast %36 : vector<1x256xf32> to vector<8x256xf32>
    %59 = arith.mulf %58, %47 : vector<8x256xf32>
    %60 = arith.addf %57, %59 : vector<8x256xf32>
    %c0_14 = arith.constant 0 : index
    %c0_15 = arith.constant 0 : index
    %61 = vector.load %arg3[%c0_14, %c0_15] : memref<8x256xf32, #tpu.memory_space<vmem>>, vector<8x256xf32>
    tpu.vector_store %arg3[%c0_14, %c0_15], %60 {strides = array<i32>} : memref<8x256xf32, #tpu.memory_space<vmem>>, vector<8x256xf32>,
    return
  }
  func.func @transform_0(%arg0: i32) -> i32 {
    %c0_i32 = arith.constant 0 : i32
    %c0_i32_0 = arith.constant 0 : i32
    return %c0_i32 : i32
  }
  func.func @transform_1(%arg0: i32) -> (i32, i32) {
    %c0_i32 = arith.constant 0 : i32
    %c0_i32_0 = arith.constant 0 : i32
    return %arg0, %c0_i32 : i32, i32
  }
  func.func @transform_2(%arg0: i32) -> (i32, i32) {
    %c0_i32 = arith.constant 0 : i32
    %c0_i32_0 = arith.constant 0 : i32
    return %arg0, %c0_i32 : i32, i32
  }
}

</mosaic_0001>

<bundles_post_ra>
// kernel: tpu_custom_call.1
= control target key start
LH: loop header
LB: loop body
LE: loop exit
PB: predicated region body
PF: predicated region fallthrough
CT: control target
= control target key end

     0   :  { %7 = vsyncpa [#allocation5], 0  ;;  %s805_s0 = inlined_call_operand.hbm [shape: f32[4], index: 0, kind: input, shape index: {}]   ;;  %s806_s1 = inlined_call_operand.hbm [shape: f32[16,256], index: 1, kind: input, shape index: {}]   ;;  %s807_s2 = inlined_call_operand.hbm [shape: f32[16,256], index: 2, kind: output, shape index: {}]  }
   0x1   :  { %8 = vsyncpa [#allocation3], 0 }
   0x2   :  { %10 = vsyncpa [#allocation3 + $0x1], 0 }
   0x3   :  { %11 = vsyncpa [#allocation4], 0 }
   0x4   :  { %13 = vsyncpa [#allocation4 + $0x1], 0  ;;  %s578_s9 = smov 0   ;;  %s580_s10 = smov 0  }
   0x5   :  { %s582_s11 = smov 0   ;;  %s584_s12 = smov 0  }
   0x6 LB: > { %s599_s13 = sadd.s32 4294967295, %s554_s12   ;;  %s359_s14 = sadd.s32 4294967294, %s554_s12   ;;  %s554_s12 = sphi %s584_s12, %s828_s12   ;;  %s550_s11 = sphi %s582_s11, %s827_s11   ;;  %s546_s10 = sphi %s580_s10, %s826_s10   ;;  %s542_s9 = sphi %s578_s9, %s825_s9  }
   0x7   : > { %p60_p0 = scmp.ne.s32.totalorder %s546_s10, %s542_s9  ;;  %p808_p1 = scmp.eq.s32.totalorder %s599_s13, 0 }
   0x8   : > { %p90_p3 = scmp.eq.s32.totalorder %s359_s14, 1  ;;  %p360_p5 = scmp.ge.s32.totalorder %s554_s12, 1 }
   0x9   : > { %p608_p4 = por %p808_p1, %p60_p0  ;;  %p97_p7 = scmp.lt.s32.totalorder %s554_s12, 3 }
   0xa   : > { %p613_p6 = por %p90_p3, %p60_p0  ;;  %s624_s18 = sadd.s32 1, %s554_s12  }
   0xb   : > { %s811_s15 = scalar_select %p608_p4, 1, 0 }
   0xc   : > { %s812_s16 = scalar_select %p613_p6, 1, 0 }
   0xd   : > { %p618_p8 = pnand %p360_p5, %p97_p7  ;;  %s44_s19 = ssub.s32 %s554_s12, %s624_s18 }
   0xe   : > { %s47_s20 = sadd.s32 1, %s550_s11  ;;  %p637_p12 = scmp.eq.s32.totalorder %s44_s19, 0 }
   0xf   : > { %p388_p10 = pneg %p618_p8  ;;  %p54_p13 = scmp.ne.s32.totalorder %s550_s11, %s546_s10 }
  0x10   : > { %p55_p0 = scmp.eq.s32.totalorder %s554_s12, 0  ;;  %p401_p3 = scmp.lt.s32.totalorder %s554_s12, 2 }
  0x11   : > { %p633_p11 = pnand %p388_p10, %p808_p1  ;;  %s441_s25 = scalar_lea.hbm %s805_s0, 16 }
  0x12   : > { %p442_p5 = scmp.ne.s32.totalorder %s805_s0, %s441_s25  ;;  %p448_p1 = scmp.lt.u32.totalorder %s441_s25, %s805_s0 }
  0x13   : > { %p443_p7 = pneg %p633_p11 }
  0x15   : > { %p444_p10 = pnand %p443_p7, %p442_p5 }
  0x17   : > { %p445_p9 = pneg %p444_p10 }
  0x19   : > { %p450_p2 = pnand %p448_p1, %p445_p9 }
  0x1b   : > { %453 = shalt.err (!%p450_p2)
}
  0x1c   : > { %s556_s30 = smov [#allocation2]   ;;  %p56_p1 = por %p55_p0, %p54_p13 }
  0x1d   : > { %391 = dma.hbm_to_smem (!%p633_p11), %s805_s0, 16, %s556_s30, [#allocation5]  }
  0x1e   : > { %s664_s5 = scalar_select %p637_p12, %s550_s11, %s47_s20  }
  0x1f   : > { %p816_p2 = scmp.eq.s32.totalorder %s599_s13, 1  ;;  %s119_s7 = sand.u32 1, %s550_s11  }
  0x20   : > { %s378_s8 = sshll.u32 %s554_s12, 8  ;;  %s363_s14 = sshll.u32 %s119_s7, 4 }
  0x21   : > { %p676_p9 = por %p816_p2, %p54_p13  ;;  %s685_s23 = scalar_lea.hbm %s806_s1, %s378_s8 }
  0x22   : > { %s123_s20 = scalar_lea.vmem [#allocation6], %s363_s14  ;;  %p689_p11 = pnand %p401_p3, %p56_p1 }
  0x23   : > { %s817_s6 = scalar_select %p676_p9, 1, 0 }
  0x24   : > { %s131_s22 = sshll.u32 %s123_s20, 4  ;;  %s120_s25 = scalar_lea.sflag [#allocation3], %s119_s7  ;;  %s693_s22 = int_to_ptr.vmem [resolvable:$true] %s131_s22 }
  0x25   : > { %s454_s26 = scalar_lea.hbm %s685_s23, 256  ;;  %p456_p13 = pneg %p689_p11 }
  0x26   : > { %p455_p12 = scmp.ne.s32.totalorder %s685_s23, %s454_s26  ;;  %s459_s29 = scalar_lea.hbm %s806_s1, 512 }
  0x27   : > { %p460_p3 = scmp.lt.u32.totalorder %s685_s23, %s806_s1  ;;  %p461_p7 = scmp.lt.u32.totalorder %s459_s29, %s454_s26 }
  0x28   : > { %p457_p0 = pnand %p456_p13, %p455_p12  ;;  %p463_p1 = scmp.lt.u32.totalorder %s454_s26, %s685_s23 }
  0x29   : > { %p462_p10 = por %p461_p7, %p460_p3 }
  0x2a   : > { %p458_p5 = pneg %p457_p0 }
  0x2b   : > { %p464_p2 = por %p463_p1, %p462_p10 }
  0x2d   : > { %p465_p6 = pnand %p464_p2, %p458_p5 }
  0x2f   : > { %468 = shalt.err (!%p465_p6)
}
  0x30   : > { %s469_s4 = scalar_lea.vmem %s693_s22, 256  ;;  %s557_s7 = smov [#allocation6]  }
  0x31   : > { %p470_p12 = scmp.ne.s32.totalorder %s693_s22, %s469_s4  ;;  %s474_s8 = sshll.u32 %s557_s7, 4  ;;  %s475_s8 = int_to_ptr.vmem [resolvable:$false] %s474_s8 }
  0x32   : > { %s476_s14 = scalar_lea.vmem %s475_s8, 512  ;;  %p477_p4 = scmp.lt.s32.totalorder %s693_s22, %s475_s8 }
  0x33   : > { %p472_p0 = pnand %p470_p12, %p456_p13  ;;  %p478_p3 = scmp.lt.s32.totalorder %s476_s14, %s469_s4 }
  0x35   : > { %p473_p9 = pneg %p472_p0  ;;  %p479_p7 = por %p478_p3, %p477_p4 }
  0x37   : > { %p480_p10 = pnand %p479_p7, %p473_p9 }
  0x39   : > { %483 = shalt.err (!%p480_p10)
}
  0x3a   : > { %395 = dma.hbm_to_vmem [thread:$0]  (!%p689_p11), %s685_s23, 256, %s693_s22, %s120_s25  }
  0x3b   : > { %140 = sbr.rel (%p618_p8) target bundleno = 220 (0xdc), region = 28  ;;  %p819_p6 = scmp.eq.s32.totalorder (!%p618_p8), %s599_s13, 0 }
  0x42   : > { %529 = dma.done.wait (%p819_p6), [#allocation5], 16   ;;  %p820_p13 = pmov %p819_p6 }
  0x43   : > { %s727_s19 = sand.u32 1, %s546_s10   ;;  %p821_p4 = scmp.ne.s32.totalorder %s811_s15, 0 }
  0x44   : > { %531 = vsyncadd (%p820_p13), [#allocation5], 4294967280  ;;  %s368_s21 = sshll.u32 %s727_s19, 4  ;;  %s147_s20 = scalar_lea.sflag [#allocation3], %s727_s19 }
  0x45   : > { %s150_s23 = scalar_lea.vmem [#allocation6], %s368_s21 }
  0x46   : > { %533 = dma.done.wait (%p821_p4), %s147_s20, 256  }
  0x47   : > { %535 = vsyncadd (%p821_p4), %s147_s20, 4294967040 }
  0x48   : > { %155 = sfence }
  0x49   : > { %v172_v0 = vld [vmem:[%s150_s23] sm:$0xff]  ;;  %s558_s17 = smov 2   ;;  %s559_s22 = smov 1   ;;  %v173_v1 = vld [vmem:[%s150_s23 + $0x8] sm:$0xff]  ;;  %v187_v2 = vlaneseq }
  0x4a   : > { %223 = vrot.lane.b32.xlu1 %v172_v0, %s558_s17  ;;  %216 = vrot.lane.b32.xlu0 %v172_v0, %s559_s22  ;;  %s560_s24 = smov 3   ;;  %s561_s25 = smov 4  }
  0x4b   : > { %s174_s26 = sld [smem:[#allocation2]]  ;;  %s737_s27 = sld [smem:[#allocation2 + $0x1]]  ;;  %v188_v3 = vand.u32 127, %v187_v2 }
  0x4c   : > { %s739_s15 = sld [smem:[#allocation2 + $0x2]]  ;;  %s372_s29 = sld [smem:[#allocation2 + $0x3]] }
  0x4d   : > { %vm190_vm0 = vcmp.ge.s32.totalorder %v188_v3, 1  ;;  %vm195_vm1 = vcmp.ge.s32.totalorder %v188_v3, 2  ;;  %vm227_vm2 = vcmp.lt.s32.totalorder %v188_v3, 2  ;;  %vm220_vm3 = vcmp.lt.s32.totalorder %v188_v3, 1  ;;  %p822_p9 = scmp.ne.s32.totalorder %s817_s6, 0 }
  0x4e   : > { %225 = vrot.lane.b32.xlu1 %v173_v1, %s558_s17  ;;  %218 = vrot.lane.b32.xlu0 %v173_v1, %s559_s22  ;;  %vm200_vm4 = vcmp.ge.s32.totalorder %v188_v3, 3  ;;  %vm234_vm5 = vcmp.lt.s32.totalorder %v188_v3, 3  ;;  %vm205_vm6 = vcmp.ge.s32.totalorder %v188_v3, 4  ;;  %vm241_vm7 = vcmp.lt.s32.totalorder %v188_v3, 4 }
  0x51   : > { %s178_s28 = sadd.f32 1.0, %s174_s26 }
  0x52   : > { %232 = vrot.lane.b32.xlu1 %v173_v1, %s560_s24  ;;  %230 = vrot.lane.b32.xlu0 %v172_v0, %s560_s24  ;;  %s180_s30 = ssub.f32 %s737_s27, %s174_s26  ;;  %v213_v9 = vstv %s372_s29  ;;  %s186_s22 = smul.f32 %s739_s15, %s737_s27 }
  0x53   : > { %s181_s3 = smul.f32 %s739_s15, %s178_s28  ;;  %s210_s4 = ssub.f32 1.0, %s739_s15 }
  0x54   : > { %s179_s7 = sadd.f32 %s739_s15, %s178_s28  ;;  %s184_s14 = smul.f32 %s739_s15, %s180_s30  ;;  %v207_v23 = vstv %s186_s22 }
  0x55   : > { %s183_s8 = ssub.f32 0.0, %s737_s27  ;;  %s747_s23 = smul.f32 %s372_s29, %s210_s4  ;;  %v208_v36 = vsel %vm205_vm6, %v207_v23, 0.0 }
  0x56   : > { %239 = vrot.lane.b32.xlu1 %v173_v1, %s561_s25  ;;  %237 = vrot.lane.b32.xlu0 %v172_v0, %s561_s25  ;;  %s182_s20 = ssub.f32 %s180_s30, %s181_s3  ;;  %v192_v6 = vstv %s179_s7  ;;  %s379_s24 = sshll.u32 %s599_s13, 8 }
  0x57   : > { %s749_s17 = ssub.f32 %s183_s8, %s184_s14  ;;  %v212_v8 = vstv %s747_s23  ;;  %v193_v10 = vsel %vm190_vm0, %v192_v6, 0.0  ;;  %s171_s25 = scalar_lea.vmem [#allocation7], %s368_s21 }
  0x58   : > { %v197_v7 = vstv %s182_s20  ;;  %v214_v13 = vsel %vm190_vm0, %v212_v8, %v213_v9  ;;  %s277_s26 = sshll.u32 %s171_s25, 4  ;;  %s761_s28 = scalar_lea.hbm %s807_s2, %s379_s24  ;;  %s763_s26 = int_to_ptr.vmem [resolvable:$true] %s277_s26 }
  0x59   : > { %v198_v11 = vsel %vm195_vm1, %v197_v7, 0.0  ;;  %v202_v15 = vstv %s749_s17  ;;  %s263_s13 = scalar_lea.sflag [#allocation4], %s727_s19  ;;  %s484_s21 = scalar_lea.vmem %s763_s26, 256 }
  0x5a   : > { %v203_v22 = vsel %vm200_vm4, %v202_v15, 0.0  ;;  %p485_p8 = scmp.ne.s32.totalorder %s763_s26, %s484_s21  ;;  %s562_s29 = smov [#allocation7]  }
  0x5b   : > { %s488_s30 = sshll.u32 %s562_s29, 4  ;;  %s489_s30 = int_to_ptr.vmem [resolvable:$false] %s488_s30 }
  0x5c   : > { %p486_p11 = pnand %p485_p8, %p822_p9  ;;  %s490_s3 = scalar_lea.vmem %s489_s30, 512 }
  0x5d   : > { %p491_p1 = scmp.lt.s32.totalorder %s763_s26, %s489_s30  ;;  %p492_p2 = scmp.lt.s32.totalorder %s490_s3, %s484_s21 }
  0x5e   : > { %p487_p5 = pneg %p486_p11 }
  0x5f   : > { %p493_p12 = por %p492_p2, %p491_p1 }
  0x61   : > { %p494_p0 = pnand %p493_p12, %p487_p5 }
  0xbc   : > { %v224_v4 = vpop.permute.xlu1 %223  ;;  %v217_v5 = vpop.permute.xlu0 %216 }
  0xc0   : > { %v226_v12 = vpop.permute.xlu1 %225  ;;  %v219_v14 = vpop.permute.xlu0 %218 }
  0xc1   : > { %v228_v16 = vsel %vm227_vm2, %v224_v4, %v226_v12  ;;  %v229_v17 = vsel %vm227_vm2, %v226_v12, %v224_v4  ;;  %v221_v18 = vsel %vm220_vm3, %v217_v5, %v219_v14  ;;  %v222_v19 = vsel %vm220_vm3, %v219_v14, %v217_v5 }
  0xc2   : > { %v244_v20 = vmul.f32 %v222_v19, %v193_v10  ;;  %v245_v21 = vmul.f32 %v221_v18, %v192_v6  ;;  %v248_v24 = vmul.f32 %v229_v17, %v198_v11  ;;  %v249_v25 = vmul.f32 %v228_v16, %v197_v7 }
  0xc4   : > { %v246_v26 = vadd.f32 %v244_v20, %v214_v13  ;;  %v247_v27 = vadd.f32 %v245_v21, %v212_v8  ;;  %v233_v28 = vpop.permute.xlu1 %232  ;;  %v231_v29 = vpop.permute.xlu0 %230 }
  0xc5   : > { %v235_v30 = vsel %vm234_vm5, %v231_v29, %v233_v28  ;;  %v236_v31 = vsel %vm234_vm5, %v233_v28, %v231_v29 }
  0xc6   : > { %v250_v32 = vadd.f32 %v248_v24, %v246_v26  ;;  %v251_v33 = vadd.f32 %v249_v25, %v247_v27  ;;  %v252_v34 = vmul.f32 %v236_v31, %v203_v22  ;;  %v253_v35 = vmul.f32 %v235_v30, %v202_v15 }
  0xc8   : > { %v240_v37 = vpop.permute.xlu1 %239  ;;  %v238_v38 = vpop.permute.xlu0 %237  ;;  %v254_v41 = vadd.f32 %v252_v34, %v250_v32  ;;  %v255_v42 = vadd.f32 %v253_v35, %v251_v33 }
  0xc9   : > { %v242_v39 = vsel %vm241_vm7, %v238_v38, %v240_v37  ;;  %v243_v40 = vsel %vm241_vm7, %v240_v37, %v238_v38 }
  0xca   : > { %v256_v43 = vmul.f32 %v243_v40, %v208_v36  ;;  %v257_v44 = vmul.f32 %v242_v39, %v207_v23 }
  0xcc   : > { %v258_v45 = vadd.f32 %v256_v43, %v254_v41  ;;  %v259_v46 = vadd.f32 %v257_v44, %v255_v42 }
  0xce   : > { %260 = vst [vmem:[%s171_s25] sm:$0xff] %v258_v45  ;;  %261 = vst [vmem:[%s171_s25 + $0x8] sm:$0xff] %v259_v46 }
  0xcf   : > { %497 = shalt.err (!%p494_p0)
}
  0xd0   : > { %s498_s19 = scalar_lea.hbm %s761_s28, 256  ;;  %s502_s8 = scalar_lea.hbm %s807_s2, 512 }
  0xd1   : > { %p499_p3 = scmp.ne.s32.totalorder %s761_s28, %s498_s19  ;;  %p503_p6 = scmp.lt.u32.totalorder %s761_s28, %s807_s2 }
  0xd2   : > { %p504_p13 = scmp.lt.u32.totalorder %s502_s8, %s498_s19  ;;  %p506_p8 = scmp.lt.u32.totalorder %s498_s19, %s761_s28 }
  0xd3   : > { %p500_p7 = pnand %p499_p3, %p822_p9 }
  0xd4   : > { %p505_p4 = por %p504_p13, %p503_p6 }
  0xd5   : > { %p501_p10 = pneg %p500_p7 }
  0xd6   : > { %p507_p11 = por %p506_p8, %p505_p4 }
  0xd8   : > { %p508_p5 = pnand %p507_p11, %p501_p10 }
  0xda   : > { %511 = shalt.err (!%p508_p5)
}
  0xdb   : > { %386 = dma.vmem_to_hbm [thread:$0]  (%p822_p9), %s763_s26, 256, %s761_s28, %s263_s13  }
  0xdc PF: > { %s289_s23 = sand.u32 1, %s542_s9   ;;  %p823_p1 = scmp.ne.s32.totalorder %s812_s16, 0 }
  0xdd   : > { %p824_p2 = scmp.ge.s32.totalorder %s554_s12, 2  ;;  %s290_s17 = scalar_lea.sflag [#allocation4], %s289_s23 }
  0xdf   : > { %p397_p12 = pnand %p824_p2, %p823_p1 }
  0xe1   : > { %537 = dma.done.wait (!%p397_p12), %s290_s17, 256  }
  0xe2   : > { %539 = vsyncadd (!%p397_p12), %s290_s17, 4294967040  ;;  %p16_p0 = scmp.ge.s32.totalorder %s624_s18, 4   ;;  %s825_s9 = smov %s546_s10 }
  0xe3   : > { %s826_s10 = smov %s550_s11  ;;  %s827_s11 = smov %s664_s5 }
  0xe4   : > { %s828_s12 = smov %s624_s18  ;;  %18 = sbr.rel (!%p16_p0) target bundleno = 6 (0x6), region = 78 }
  0xeb   :  { %295 = vsyncpa [#allocation3], 1 }
  0xec   :  { %297 = vsyncpa [#allocation3 + $0x1], 1 }
  0xed   :  { %298 = vsyncpa [#allocation4], 1 }
  0xee   :  { %300 = vsyncpa [#allocation4 + $0x1], 1 }
  0xef   :  { %301 = vsyncpa [#allocation5], 1 }
  0xf0   :  { %303 = vsyncpa [#allocation5 + $0x1], 1 }

</bundles_post_ra>
